<compile_context>
chip_gen: v5e
topology: v5e:2x2
jax: 0.10.0
libtpu: 0.0.40
codegen_flags: <defaults>
</compile_context>

<pallas_src>
import jax
import jax.numpy as jnp
from jax.experimental import pallas as pl
from jax.experimental.pallas import tpu as pltpu


def _round_up(x, m):
    return ((x + m - 1) // m) * m


def _head_kernel(x_ref, w1_ref, w2_ref, vec_ref, o_ref):
    # vec_ref rows: 0 = b1, 1 = b2' (BN1 folded), 2 = wp' (BN2 folded),
    #               3 = bp' broadcast across lanes.
    x = x_ref[...].astype(w1_ref.dtype)                              # (TB, Din)

    # layer1 + bias + ReLU   (BN1 scale/shift live inside W2'/b2')
    h = jnp.dot(x, w1_ref[...], preferred_element_type=jnp.float32)
    h = jnp.maximum(h + vec_ref[0:1, :], 0.0)

    # layer2 + bias + ReLU   (BN2 scale/shift live inside wp'/bp')
    h = jnp.dot(h.astype(w2_ref.dtype), w2_ref[...],
                preferred_element_type=jnp.float32)
    h = jnp.maximum(h + vec_ref[1:2, :], 0.0)

    # TODO(synk): training-mode dropout (stochastic, via pltpu.prng_*) is not
    # implemented; the inference forward treats it as identity.

    # projection: Linear(inner_dim -> 1) as a lane reduction (XLU, free slot).
    out = jnp.sum(h * vec_ref[2:3, :], axis=1, keepdims=True) + vec_ref[3:4, 0:1]
    o_ref[...] = out.astype(o_ref.dtype)


def one_sentence_classification_head(feature, params, *, eps=1e-5,
                                     block_b=None, weights_dtype=None):
    """Inference forward of OneSentenceClassificationHead as one fused kernel.

    weights_dtype: None (keep f32) or jnp.bfloat16 (recommended on v6e/v7x:
    halves weight DMA, native MXU dtype, f32 accumulation kept).
    """
    # CLS-token pooling as a cheap XLA slice: the kernel never sees tokens 1..S-1.
    x = feature[:, 0, :]
    B, d_in = x.shape
    d_inner = params["w1"].shape[1]

    # ---- Fold eval-mode BatchNorm1d THROUGH the following matmuls (once). ----
    s1 = params["bn1_gamma"] * jax.lax.rsqrt(params["bn1_var"] + eps)
    t1 = params["bn1_beta"] - params["bn1_mean"] * s1
    s2 = params["bn2_gamma"] * jax.lax.rsqrt(params["bn2_var"] + eps)
    t2 = params["bn2_beta"] - params["bn2_mean"] * s2

    w1 = params["w1"]                                   # (Din, H)
    b1 = params["b1"]                                   # (H,)
    w2 = params["w2"] * s1[:, None]                     # BN1 scale folded
    b2 = t1 @ params["w2"] + params["b2"]               # BN1 shift folded
    wp = params["wp"][0] * s2                           # (H,)  BN2 scale folded
    bp = jnp.dot(params["wp"][0], t2) + params["bp"][0]  # scalar, BN2 shift folded

    # Pack every remaining small vector into ONE (8, H) f32 block (1 small DMA).
    vec = jnp.zeros((8, d_inner), jnp.float32)
    vec = vec.at[0].set(b1.astype(jnp.float32))
    vec = vec.at[1].set(b2.astype(jnp.float32))
    vec = vec.at[2].set(wp.astype(jnp.float32))
    vec = vec.at[3].set(jnp.full((d_inner,), bp, jnp.float32))

    if weights_dtype is not None:
        w1 = w1.astype(weights_dtype)
        w2 = w2.astype(weights_dtype)

    # ---- Batch tiling ----
    if block_b is None:
        if B <= 2048:
            # One block: weights DMA'd exactly once, no per-step overhead.
            block_b = _round_up(max(B, 1), 8)
        else:
            # Large B: big tiles (amortize ~0.35us/step) but grid >= 2 so the
            # "parallel" axis shards across v7x's two TensorCores.
            block_b = min(2048, _round_up(pl.cdiv(B, 2), 8))
    block_b = max(8, _round_up(block_b, 8))
    B_pad = _round_up(B, block_b)
    if B_pad != B:
        x = jnp.pad(x, ((0, B_pad - B), (0, 0)))
    grid = (B_pad // block_b,)

    flops = 2 * B_pad * (d_in * d_inner + d_inner * d_inner + d_inner)
    bytes_accessed = (x.dtype.itemsize * B_pad * d_in
                      + w1.dtype.itemsize * d_in * d_inner
                      + w2.dtype.itemsize * d_inner * d_inner
                      + 4 * 8 * d_inner
                      + feature.dtype.itemsize * B_pad)

    out = pl.pallas_call(
        _head_kernel,
        out_shape=jax.ShapeDtypeStruct((B_pad, 1), feature.dtype),
        grid_spec=pltpu.PrefetchScalarGridSpec(
            num_scalar_prefetch=0,
            grid=grid,
            in_specs=[
                pl.BlockSpec((block_b, d_in), lambda b: (b, 0)),      # CLS rows
                pl.BlockSpec((d_in, d_inner), lambda b: (0, 0)),      # W1
                pl.BlockSpec((d_inner, d_inner), lambda b: (0, 0)),   # W2' (BN1 folded)
                pl.BlockSpec((8, d_inner), lambda b: (0, 0)),         # packed vectors
            ],
            out_specs=pl.BlockSpec((block_b, 1), lambda b: (b, 0)),
        ),
        compiler_params=pltpu.CompilerParams(
            dimension_semantics=("parallel",)),
        cost_estimate=pl.CostEstimate(
            flops=flops, transcendentals=0, bytes_accessed=bytes_accessed),
    )(x, w1, w2, vec)

    return out[:B] if B_pad != B else out


def head_forward_ref(feature, params, *, eps=1e-5):
    """Pure-JAX reference mirroring the PyTorch module (eval mode)."""
    x = feature[:, 0, :]
    h = x @ params["w1"] + params["b1"]
    h = jnp.maximum(h, 0.0)
    h = ((h - params["bn1_mean"]) * jax.lax.rsqrt(params["bn1_var"] + eps)
         * params["bn1_gamma"] + params["bn1_beta"])
    h = h @ params["w2"] + params["b2"]
    h = jnp.maximum(h, 0.0)
    h = ((h - params["bn2_mean"]) * jax.lax.rsqrt(params["bn2_var"] + eps)
         * params["bn2_gamma"] + params["bn2_beta"])
    return h @ params["wp"].T + params["bp"]


def init_head_params(key, input_dim, inner_dim):
    ks = jax.random.split(key, 8)

    def lin(k, fan_in, shape):
        bound = 1.0 / jnp.sqrt(float(fan_in))
        return jax.random.uniform(k, shape, jnp.float32, -bound, bound)

    return dict(
        # Linear weights stored pre-transposed as (in, out) so the kernel does x @ W.
        w1=lin(ks[0], input_dim, (input_dim, inner_dim)),
        b1=lin(ks[1], input_dim, (inner_dim,)),
        w2=lin(ks[2], inner_dim, (inner_dim, inner_dim)),
        b2=lin(ks[3], inner_dim, (inner_dim,)),
        wp=lin(ks[4], inner_dim, (1, inner_dim)),   # PyTorch layout (out=1, in)
        bp=lin(ks[5], inner_dim, (1,)),
        # BatchNorm1d affine params + running stats (non-trivial values for test).
        bn1_gamma=1.0 + 0.1 * jax.random.normal(ks[6], (inner_dim,), jnp.float32),
        bn1_beta=0.1 * jax.random.normal(jax.random.fold_in(ks[6], 1), (inner_dim,), jnp.float32),
        bn1_mean=0.1 * jax.random.normal(jax.random.fold_in(ks[6], 2), (inner_dim,), jnp.float32),
        bn1_var=jax.random.uniform(jax.random.fold_in(ks[6], 3), (inner_dim,), jnp.float32, 0.5, 1.5),
        bn2_gamma=1.0 + 0.1 * jax.random.normal(ks[7], (inner_dim,), jnp.float32),
        bn2_beta=0.1 * jax.random.normal(jax.random.fold_in(ks[7], 1), (inner_dim,), jnp.float32),
        bn2_mean=0.1 * jax.random.normal(jax.random.fold_in(ks[7], 2), (inner_dim,), jnp.float32),
        bn2_var=jax.random.uniform(jax.random.fold_in(ks[7], 3), (inner_dim,), jnp.float32, 0.5, 1.5),
    )


if __name__ == "__main__":
    # batch=8, seq=8, input_dim=128, inner_dim=128 (lane-dense feature dims).
    B, S, D_IN, D_INNER = 8, 8, 128, 128
    key = jax.random.PRNGKey(0)
    kx, kp = jax.random.split(key)
    feature = jax.random.normal(kx, (B, S, D_IN), jnp.float32)
    params = init_head_params(kp, D_IN, D_INNER)

    # f32 path (default) against the eval-mode reference.
    out = one_sentence_classification_head(feature, params)
    jax.block_until_ready(out)
    ref = head_forward_ref(feature, params)
    assert out.shape == (B, 1) and out.dtype == jnp.float32
    max_err = jnp.max(jnp.abs(out - ref))
    assert jnp.allclose(out, ref, atol=1e-4, rtol=1e-4), f"f32 max abs err {max_err}"

    # Non-multiple-of-8 batch exercises the pad-and-slice path (no giant fallback block).
    B2 = 20
    feature2 = jax.random.normal(jax.random.fold_in(kx, 1), (B2, S, D_IN), jnp.float32)
    out2 = one_sentence_classification_head(feature2, params)
    jax.block_until_ready(out2)
    ref2 = head_forward_ref(feature2, params)
    assert out2.shape == (B2, 1)
    err2 = jnp.max(jnp.abs(out2 - ref2))
    assert jnp.allclose(out2, ref2, atol=1e-4, rtol=1e-4), f"pad path max abs err {err2}"

    # bf16 weight path (v6e/v7x recommendation) — f32 accumulation, looser tolerance.
    out_bf16 = one_sentence_classification_head(feature, params,
                                                weights_dtype=jnp.bfloat16)
    jax.block_until_ready(out_bf16)
    err_bf16 = jnp.max(jnp.abs(out_bf16 - ref))
    assert jnp.allclose(out_bf16, ref, atol=5e-2, rtol=5e-2), f"bf16 max abs err {err_bf16}"

    print("KERNEL_OK")
</pallas_src>

<mosaic_0001>
module attributes {stable_mosaic.version = 11 : i64} {
  func.func @_head_kernel(%arg0: i32, %arg1: memref<8x128xf32, #tpu.memory_space<vmem>>, %arg2: memref<128x128xf32, #tpu.memory_space<vmem>>, %arg3: memref<128x128xf32, #tpu.memory_space<vmem>>, %arg4: memref<8x128xf32, #tpu.memory_space<vmem>>, %arg5: memref<8x1xf32, #tpu.memory_space<vmem>>) attributes {dimension_semantics = [#tpu.dimension_semantics<parallel>], iteration_bounds = array<i64: 1>, scalar_prefetch = 0 : i64, scratch_operands = 0 : i64, tpu.core_type = #tpu.core_type<tc>, window_params = [{transform_indices = @transform_0, window_bounds = array<i64: 8, 128>}, {pipeline_mode = #tpu.pipeline_mode<synchronous>, transform_indices = @transform_1, window_bounds = array<i64: 128, 128>}, {pipeline_mode = #tpu.pipeline_mode<synchronous>, transform_indices = @transform_2, window_bounds = array<i64: 128, 128>}, {pipeline_mode = #tpu.pipeline_mode<synchronous>, transform_indices = @transform_3, window_bounds = array<i64: 8, 128>}, {transform_indices = @transform_4, window_bounds = array<i64: 8, 1>}]} {
    %c0 = arith.constant 0 : index
    %c0_0 = arith.constant 0 : index
    %0 = vector.load %arg1[%c0, %c0_0] : memref<8x128xf32, #tpu.memory_space<vmem>>, vector<8x128xf32>
    %c0_1 = arith.constant 0 : index
    %c0_2 = arith.constant 0 : index
    %1 = vector.load %arg2[%c0_1, %c0_2] : memref<128x128xf32, #tpu.memory_space<vmem>>, vector<128x128xf32>
    %cst = arith.constant dense<0.000000e+00> : vector<8x128xf32>
    %2 = tpu.matmul %0, %1, %cst {dimension_numbers = #tpu.dot_dimension_numbers<[1], [0], [0], [1], [0, 0, 1, 1], [], []>} : vector<8x128xf32>, vector<128x128xf32>, vector<8x128xf32> -> vector<8x128xf32>
    %c0_3 = arith.constant 0 : index
    %c0_4 = arith.constant 0 : index
    %3 = vector.load %arg4[%c0_3, %c0_4] : memref<8x128xf32, #tpu.memory_space<vmem>>, vector<1x128xf32>
    %4 = vector.broadcast %3 : vector<1x128xf32> to vector<8x128xf32>
    %5 = arith.addf %2, %4 : vector<8x128xf32>
    %cst_5 = arith.constant 0.000000e+00 : f32
    %6 = vector.broadcast %cst_5 : f32 to vector<8x128xf32>
    %7 = arith.maximumf %5, %6 : vector<8x128xf32>
    %c0_6 = arith.constant 0 : index
    %c0_7 = arith.constant 0 : index
    %8 = vector.load %arg3[%c0_6, %c0_7] : memref<128x128xf32, #tpu.memory_space<vmem>>, vector<128x128xf32>
    %cst_8 = arith.constant dense<0.000000e+00> : vector<8x128xf32>
    %9 = tpu.matmul %7, %8, %cst_8 {dimension_numbers = #tpu.dot_dimension_numbers<[1], [0], [0], [1], [0, 0, 1, 1], [], []>} : vector<8x128xf32>, vector<128x128xf32>, vector<8x128xf32> -> vector<8x128xf32>
    %c1 = arith.constant 1 : index
    %c0_9 = arith.constant 0 : index
    %10 = vector.load %arg4[%c1, %c0_9] : memref<8x128xf32, #tpu.memory_space<vmem>>, vector<1x128xf32>
    %11 = vector.broadcast %10 : vector<1x128xf32> to vector<8x128xf32>
    %12 = arith.addf %9, %11 : vector<8x128xf32>
    %cst_10 = arith.constant 0.000000e+00 : f32
    %13 = vector.broadcast %cst_10 : f32 to vector<8x128xf32>
    %14 = arith.maximumf %12, %13 : vector<8x128xf32>
    %c2 = arith.constant 2 : index
    %c0_11 = arith.constant 0 : index
    %15 = vector.load %arg4[%c2, %c0_11] : memref<8x128xf32, #tpu.memory_space<vmem>>, vector<1x128xf32>
    %16 = vector.broadcast %15 : vector<1x128xf32> to vector<8x128xf32>
    %17 = arith.mulf %14, %16 : vector<8x128xf32>
    %cst_12 = arith.constant dense<0.000000e+00> : vector<8xf32>
    %18 = vector.multi_reduction <add>, %17, %cst_12 [1] : vector<8x128xf32> to vector<8xf32>
    %19 = vector.shape_cast %18 : vector<8xf32> to vector<8x1xf32>
    %c3 = arith.constant 3 : index
    %c0_13 = arith.constant 0 : index
    %20 = vector.load %arg4[%c3, %c0_13] : memref<8x128xf32, #tpu.memory_space<vmem>>, vector<1x1xf32>
    %21 = vector.broadcast %20 : vector<1x1xf32> to vector<8x1xf32>
    %22 = arith.addf %19, %21 : vector<8x1xf32>
    %c0_14 = arith.constant 0 : index
    %c0_15 = arith.constant 0 : index
    %23 = vector.load %arg5[%c0_14, %c0_15] : memref<8x1xf32, #tpu.memory_space<vmem>>, vector<8x1xf32>
    tpu.vector_store %arg5[%c0_14, %c0_15], %22 {strides = array<i32>} : memref<8x1xf32, #tpu.memory_space<vmem>>, vector<8x1xf32>,
    return
  }
  func.func @transform_0(%arg0: i32) -> (i32, i32) {
    %c0_i32 = arith.constant 0 : i32
    %c0_i32_0 = arith.constant 0 : i32
    return %arg0, %c0_i32 : i32, i32
  }
  func.func @transform_1(%arg0: i32) -> (i32, i32) {
    %c0_i32 = arith.constant 0 : i32
    %c0_i32_0 = arith.constant 0 : i32
    %c0_i32_1 = arith.constant 0 : i32
    return %c0_i32, %c0_i32_0 : i32, i32
  }
  func.func @transform_2(%arg0: i32) -> (i32, i32) {
    %c0_i32 = arith.constant 0 : i32
    %c0_i32_0 = arith.constant 0 : i32
    %c0_i32_1 = arith.constant 0 : i32
    return %c0_i32, %c0_i32_0 : i32, i32
  }
  func.func @transform_3(%arg0: i32) -> (i32, i32) {
    %c0_i32 = arith.constant 0 : i32
    %c0_i32_0 = arith.constant 0 : i32
    %c0_i32_1 = arith.constant 0 : i32
    return %c0_i32, %c0_i32_0 : i32, i32
  }
  func.func @transform_4(%arg0: i32) -> (i32, i32) {
    %c0_i32 = arith.constant 0 : i32
    %c0_i32_0 = arith.constant 0 : i32
    return %arg0, %c0_i32 : i32, i32
  }
}

</mosaic_0001>

<bundles_post_ra>
// kernel: tpu_custom_call.1
= control target key start
LH: loop header
LB: loop body
LE: loop exit
PB: predicated region body
PF: predicated region fallthrough
CT: control target
= control target key end

     0   :  { %9 = vsyncpa [#allocation3], 0  ;;  %s330_s0 = inlined_call_operand.hbm [shape: f32[8,128], index: 0, kind: input, shape index: {}]   ;;  %s331_s1 = inlined_call_operand.hbm [shape: f32[128,128], index: 1, kind: input, shape index: {}]   ;;  %s332_s2 = inlined_call_operand.hbm [shape: f32[128,128], index: 2, kind: input, shape index: {}]   ;;  %s333_s3 = inlined_call_operand.hbm [shape: f32[8,128], index: 3, kind: input, shape index: {}]   ;;  %s334_s4 = inlined_call_operand.vmem [shape: f32[8,1], index: 4, kind: output, shape index: {}]  }
   0x1   :  { %10 = vsyncpa [#allocation5], 0  ;;  %s27_s17 = sshll.u32 %s331_s1, 4  ;;  %s28_s17 = int_to_ptr.hbm [resolvable:$true] %s27_s17 }
   0x2   :  { %11 = vsyncpa [#allocation8], 0  ;;  %s284_s18 = smov [#allocation4]   ;;  %s17_s22 = sshll.u32 %s330_s0, 4  ;;  %s18_s22 = int_to_ptr.hbm [resolvable:$true] %s17_s22 }
   0x3   :  { %s29_s19 = sshll.u32 %s284_s18, 4  ;;  %s285_s23 = smov 128   ;;  %s30_s19 = int_to_ptr.vmem [resolvable:$true] %s29_s19 }
   0x4   :  { %s286_s24 = smov 8   ;;  %s287_s25 = smov [#allocation2]  }
   0x5   :  { %35 = dma.hbm_to_vmem [thread:$0]  %s28_s17, 2048, %s30_s19, [#allocation5], %s285_s23, %s285_s23, %s286_s24  }
   0x6   :  { %s19_s26 = sshll.u32 %s287_s25, 4  ;;  %s40_s29 = sshll.u32 %s332_s2, 4  ;;  %s20_s26 = int_to_ptr.vmem [resolvable:$true] %s19_s26  ;;  %s41_s29 = int_to_ptr.hbm [resolvable:$true] %s40_s29 }
   0x7   :  { %22 = dma.hbm_to_vmem [thread:$0]  %s18_s22, 128, %s20_s26, [#allocation3]  }
   0x8   :  { %s54_s5 = sshll.u32 %s333_s3, 4  ;;  %s288_s6 = smov [#allocation6]   ;;  %s55_s5 = int_to_ptr.hbm [resolvable:$true] %s54_s5 }
   0x9   :  { %s42_s7 = sshll.u32 %s288_s6, 4  ;;  %s289_s0 = smov [#allocation7]   ;;  %s43_s7 = int_to_ptr.vmem [resolvable:$true] %s42_s7 }
   0xa   :  { %48 = dma.hbm_to_vmem [thread:$0]  %s41_s29, 2048, %s43_s7, [#allocation5], %s285_s23, %s285_s23, %s286_s24  }
   0xb   :  { %s56_s8 = sshll.u32 %s289_s0, 4  ;;  %s57_s8 = int_to_ptr.vmem [resolvable:$true] %s56_s8 }
   0xc   :  { %59 = dma.hbm_to_vmem [thread:$0]  %s55_s5, 128, %s57_s8, [#allocation8]  }
   0xd   :  { %278 = dma.done.wait [#allocation3], 128  }
   0xe   :  { %279 = vsyncadd [#allocation3], 4294967168 }
   0xf   :  { %280 = dma.done.wait [#allocation5], 4096  }
  0x10   :  { %281 = vsyncadd [#allocation5], 4294963200 }
  0x11   :  { %282 = dma.done.wait [#allocation8], 128  }
  0x12   :  { %283 = vsyncadd [#allocation8], 4294967168  ;;  %v92_v0 = vld [vmem:[#allocation4 + $0x78] sm:$0xff]  ;;  %v91_v1 = vld [vmem:[#allocation4 + $0x70] sm:$0xff]  ;;  %vm163_vm0 = vcmask 7168  }
  0x13   :  { %95 = vmatpush.msra.mxu0 %v92_v0  ;;  %v90_v2 = vld [vmem:[#allocation4 + $0x68] sm:$0xff]  ;;  %v89_v3 = vld [vmem:[#allocation4 + $0x60] sm:$0xff]  ;;  %v131_v4 = vld [vmem:[#allocation6 + $0x78] sm:$0xff] }
  0x14   :  { %v88_v5 = vld [vmem:[#allocation4 + $0x58] sm:$0xff]  ;;  %134 = vmatpush.msra.mxu1 %v131_v4  ;;  %v130_v6 = vld [vmem:[#allocation6 + $0x70] sm:$0xff]  ;;  %v129_v7 = vld [vmem:[#allocation6 + $0x68] sm:$0xff] }
  0x15   :  { %96 = vmatpush.msra.mxu0 %v91_v1  ;;  %v87_v8 = vld [vmem:[#allocation4 + $0x50] sm:$0xff]  ;;  %v128_v9 = vld [vmem:[#allocation6 + $0x60] sm:$0xff]  ;;  %v86_v10 = vld [vmem:[#allocation4 + $0x48] sm:$0xff] }
  0x16   :  { %135 = vmatpush.msra.mxu1 %v130_v6  ;;  %v127_v11 = vld [vmem:[#allocation6 + $0x58] sm:$0xff]  ;;  %v85_v12 = vld [vmem:[#allocation4 + $0x40] sm:$0xff]  ;;  %v126_v13 = vld [vmem:[#allocation6 + $0x50] sm:$0xff] }
  0x17   :  { %97 = vmatpush.msra.mxu0 %v90_v2  ;;  %v84_v14 = vld [vmem:[#allocation4 + $0x38] sm:$0xff]  ;;  %v125_v15 = vld [vmem:[#allocation6 + $0x48] sm:$0xff]  ;;  %v83_v16 = vld [vmem:[#allocation4 + $0x30] sm:$0xff] }
  0x18   :  { %136 = vmatpush.msra.mxu1 %v129_v7  ;;  %v124_v17 = vld [vmem:[#allocation6 + $0x40] sm:$0xff]  ;;  %v82_v18 = vld [vmem:[#allocation4 + $0x28] sm:$0xff]  ;;  %v123_v19 = vld [vmem:[#allocation6 + $0x38] sm:$0xff] }
  0x19   :  { %98 = vmatpush.msra.mxu0 %v89_v3  ;;  %v81_v20 = vld [vmem:[#allocation4 + $0x20] sm:$0xff]  ;;  %v122_v21 = vld [vmem:[#allocation6 + $0x30] sm:$0xff]  ;;  %v80_v22 = vld [vmem:[#allocation4 + $0x18] sm:$0xff] }
  0x1a   :  { %137 = vmatpush.msra.mxu1 %v128_v9  ;;  %v121_v23 = vld [vmem:[#allocation6 + $0x28] sm:$0xff]  ;;  %v79_v24 = vld [vmem:[#allocation4 + $0x10] sm:$0xff]  ;;  %v120_v25 = vld [vmem:[#allocation6 + $0x20] sm:$0xff] }
  0x1b   :  { %99 = vmatpush.msra.mxu0 %v88_v5  ;;  %v78_v26 = vld [vmem:[#allocation4 + $0x8] sm:$0xff]  ;;  %v119_v27 = vld [vmem:[#allocation6 + $0x18] sm:$0xff]  ;;  %v77_v28 = vld [vmem:[#allocation4] sm:$0xff] }
  0x1c   :  { %138 = vmatpush.msra.mxu1 %v127_v11  ;;  %v76_v29 = vld [vmem:[#allocation2] sm:$0xff]  ;;  %v118_v30 = vld [vmem:[#allocation6 + $0x10] sm:$0xff]  ;;  %v117_v31 = vld [vmem:[#allocation6 + $0x8] sm:$0xff] }
  0x1d   :  { %100 = vmatpush.msra.mxu0 %v87_v8  ;;  %v116_v32 = vld [vmem:[#allocation6] sm:$0xff] }
  0x1e   :  { %139 = vmatpush.msra.mxu1 %v126_v13  ;;  %v178_v33 = vld [vmem:[#allocation7] ss:$0 sm:$0xff]  ;;  %v179_v37 = vld [vmem:[#allocation7 + $0x1] ss:$0 sm:$0xff]  ;;  %v180_v40 = vld [vmem:[#allocation7 + $0x2] ss:$0 sm:$0xff] }
  0x1f   :  { %101 = vmatpush.msra.mxu0 %v86_v10  ;;  %v181_v43 = vld [vmem:[#allocation7 + $0x3] ss:$0 sm:$0xff] }
  0x20   :  { %140 = vmatpush.msra.mxu1 %v125_v15 }
  0x21   :  { %102 = vmatpush.msra.mxu0 %v85_v12 }
  0x22   :  { %141 = vmatpush.msra.mxu1 %v124_v17 }
  0x23   :  { %103 = vmatpush.msra.mxu0 %v84_v14 }
  0x24   :  { %142 = vmatpush.msra.mxu1 %v123_v19 }
  0x25   :  { %104 = vmatpush.msra.mxu0 %v83_v16 }
  0x26   :  { %143 = vmatpush.msra.mxu1 %v122_v21 }
  0x27   :  { %105 = vmatpush.msra.mxu0 %v82_v18 }
  0x28   :  { %144 = vmatpush.msra.mxu1 %v121_v23 }
  0x29   :  { %106 = vmatpush.msra.mxu0 %v81_v20 }
  0x2a   :  { %145 = vmatpush.msra.mxu1 %v120_v25 }
  0x2b   :  { %107 = vmatpush.msra.mxu0 %v80_v22 }
  0x2c   :  { %146 = vmatpush.msra.mxu1 %v119_v27 }
  0x2d   :  { %108 = vmatpush.msra.mxu0 %v79_v24 }
  0x2e   :  { %147 = vmatpush.msra.mxu1 %v118_v30 }
  0x2f   :  { %109 = vmatpush.msra.mxu0 %v78_v26 }
  0x30   :  { %148 = vmatpush.msra.mxu1 %v117_v31 }
  0x31   :  { %110 = vmatpush.msra.mxu0 %v77_v28 }
  0x32   :  { %111 = vmatmul.f32.vlgmr.msra.gmra.mxu0 %v76_v29  ;;  %149 = vmatpush.msra.mxu1 %v116_v32 }
  0xaf   :  { %v112_v34 = vpop.f32.mrf.mxu0 }
  0xb0   :  { %v113_v35 = vadd.f32 %v178_v33, %v112_v34 }
  0xb2   :  { %v115_v36 = vmax.f32 %v113_v35, 0.0 }
  0xb4   :  { %150 = vmatmul.f32.vlgmr.msra.gmra.mxu1 %v115_v36 }
 0x131   :  { %v151_v38 = vpop.f32.mrf.mxu1 }
 0x132   :  { %v152_v39 = vadd.f32 %v179_v37, %v151_v38 }
 0x134   :  { %v154_v41 = vmax.f32 %v152_v39, 0.0 }
 0x136   :  { %v157_v42 = vmul.f32 %v180_v40, %v154_v41 }
 0x138   :  { %158 = vadd.xlane.f32.xlu0 %v157_v42 }
 0x1ab   :  { %v159_v44 = vpop.xlane.xlu0 %158 }
 0x1ac   :  { %v162_v45 = vadd.f32 %v181_v43, %v159_v44 }
 0x1ae   :  { %164 = vst.msk [vmem:[%s334_s4] sm:$0xff] %vm163_vm0, %v162_v45 }
 0x1af   :  { %169 = vsyncpa [#allocation3], 1 }
 0x1b0   :  { %170 = vsyncpa [#allocation5], 1 }
 0x1b1   :  { %171 = vsyncpa [#allocation8], 1 }

</bundles_post_ra>
